<compile_context>
chip_gen: v6e
topology: v6e:2x2x1
jax: 0.10.0
libtpu: 0.0.40
codegen_flags: <defaults>
</compile_context>

<pallas_src>
import math

import jax
import jax.numpy as jnp
from jax.experimental import pallas as pl
from jax.experimental.pallas import tpu as pltpu


_TARGET_BLOCK_BYTES = 4 * 1024 * 1024   # ~4 MiB per block (x4 resident w/ dbl-buffer)
_MAX_COLS = 8192                        # elements per contiguous lane stripe
_VMEM_LIMIT_BYTES = 32 * 1024 * 1024    # safe on v5e / v6e / v7x


def _copy_kernel(x_ref, o_ref):
    # Straight VMEM copy of the current (tile_r, cols) block.
    o_ref[...] = x_ref[...]


def _tile_rows(rows, cols, itemsize, target_bytes, sub):
    """Pick a row-tile that divides `rows`, is sublane-aligned, and fits target."""
    if rows == 1:
        return 1
    if rows % sub == 0:
        align = sub
    elif rows % 8 == 0:
        align = 8
    else:
        # Rows can't be tiled on an 8-aligned boundary; only legal block is the
        # full rows extent — accept it only if it is small enough.
        return rows if rows * cols * itemsize <= target_bytes else None
    max_r = max(align, target_bytes // (cols * itemsize))
    tile_r = align
    t = align
    hi = min(rows, max_r)
    while t <= hi:
        if rows % t == 0:
            tile_r = t
        t += align
    return tile_r


def _copy_plan(total, itemsize):
    """Return (pad_elems, rows, cols, tile_r) for copying a flat buffer."""
    sub = max(8, 32 // itemsize)  # dtype-aware sublane packing (8 f32 / 16 bf16 / 32 i8)

    # 1) Exact lane-dense factorization: cols | total and cols % 128 == 0.
    cols = 0
    c = 128
    cap = min(total, _MAX_COLS)
    while c <= cap:
        if total % c == 0:
            cols = c
        c += 128
    if cols:
        rows = total // cols
        tile_r = _tile_rows(rows, cols, itemsize, _TARGET_BLOCK_BYTES, sub)
        if tile_r is not None:
            return 0, rows, cols, tile_r

    # 2) Small awkward sizes: one block covering the whole (1, total) slab.
    #    (block == full array dims is always legal; capped well under VMEM.)
    if total * itemsize <= _TARGET_BLOCK_BYTES:
        return 0, 1, total, 1

    # 3) Large awkward sizes: pad the flat buffer to a lane-dense multiple,
    #    tile it, and slice the padding back off afterwards.
    #    TODO(synk): replace the jnp.pad round-trip with a main + remainder
    #    pallas_call pair to avoid the extra pad copy on pathological sizes.
    cols = 2048
    quantum = sub * cols
    padded = ((total + quantum - 1) // quantum) * quantum
    rows = padded // cols
    tile_r = _tile_rows(rows, cols, itemsize, _TARGET_BLOCK_BYTES, sub)
    return padded - total, rows, cols, tile_r


def _pallas_copy_2d(x2d, tile_r, logical_bytes):
    rows, cols = x2d.shape
    grid = (rows // tile_r,)
    return pl.pallas_call(
        _copy_kernel,
        out_shape=jax.ShapeDtypeStruct((rows, cols), x2d.dtype),
        grid=grid,
        in_specs=[pl.BlockSpec((tile_r, cols), lambda i: (i, 0))],
        out_specs=pl.BlockSpec((tile_r, cols), lambda i: (i, 0)),
        compiler_params=pltpu.CompilerParams(
            dimension_semantics=("parallel",),      # shard rows across TCs (v7x)
            vmem_limit_bytes=_VMEM_LIMIT_BYTES,
        ),
        cost_estimate=pl.CostEstimate(
            flops=0, transcendentals=0, bytes_accessed=2 * logical_bytes
        ),
    )(x2d)


def _pallas_copy_flat(flat):
    total = flat.shape[0]
    itemsize = flat.dtype.itemsize
    pad, rows, cols, tile_r = _copy_plan(total, itemsize)
    if pad:
        flat = jnp.pad(flat, (0, pad))
    x2d = flat.reshape(rows, cols)                       # metadata-only glue
    out2d = _pallas_copy_2d(x2d, tile_r, total * itemsize)
    out_flat = out2d.reshape(rows * cols)
    if pad:
        out_flat = out_flat[:total]
    return out_flat


def flatten_pallas(x: jax.Array, dim: int) -> jax.Array:
    """Equivalent of torch.flatten(x, dim); data path runs through Pallas."""
    shape = x.shape
    ndim = len(shape)
    if ndim == 0:
        out_shape = (1,)
    else:
        d = dim + ndim if dim < 0 else dim
        if not (0 <= d < ndim):
            raise ValueError(f"flatten dim {dim} out of range for rank {ndim}")
        out_shape = tuple(shape[:d]) + (int(math.prod(shape[d:])),)

    total = int(math.prod(shape)) if ndim else 1
    if total == 0:
        return x.reshape(out_shape)  # nothing to copy

    flat = x.reshape(total)          # C-order, matches torch.flatten semantics
    out_flat = _pallas_copy_flat(flat)
    return out_flat.reshape(out_shape)


if __name__ == "__main__":
    key = jax.random.PRNGKey(0)
    # NCHW input, matching the CLAP audio-encoder usage (Flatten(1) on a conv map).
    N, C, H, W = 2, 4, 16, 16
    x = jax.random.normal(key, (N, C, H, W), dtype=jnp.float32)

    flatten_jit = jax.jit(flatten_pallas, static_argnums=1)

    # Flatten(1): (N, C, H, W) -> (N, C*H*W)
    out = jax.block_until_ready(flatten_jit(x, 1))
    ref = x.reshape(N, C * H * W)
    assert out.shape == (N, C * H * W), out.shape
    assert out.dtype == x.dtype
    assert bool(jnp.array_equal(out, ref))

    # Flatten(2): (N, C, H, W) -> (N, C, H*W)
    out2 = jax.block_until_ready(flatten_jit(x, 2))
    assert out2.shape == (N, C, H * W)
    assert bool(jnp.array_equal(out2, x.reshape(N, C, H * W)))

    # Non-128-divisible element count -> small single-block path (no OOM cliff).
    y = jax.random.normal(jax.random.PRNGKey(1), (2, 3, 10, 10), dtype=jnp.float32)
    out3 = jax.block_until_ready(flatten_jit(y, 1))
    assert out3.shape == (2, 300)
    assert bool(jnp.array_equal(out3, y.reshape(2, 300)))

    # Packed dtype (bf16) exercises the dtype-aware sublane alignment.
    xb = x.astype(jnp.bfloat16)
    out4 = jax.block_until_ready(flatten_jit(xb, 1))
    assert out4.dtype == jnp.bfloat16
    assert bool(jnp.array_equal(out4, xb.reshape(N, C * H * W)))

    print("KERNEL_OK")
</pallas_src>

<mosaic_0001>
module attributes {stable_mosaic.version = 11 : i64} {
  func.func @_copy_kernel(%arg0: i32, %arg1: memref<1x2048xf32, #tpu.memory_space<vmem>>, %arg2: memref<1x2048xf32, #tpu.memory_space<vmem>>) attributes {dimension_semantics = [#tpu.dimension_semantics<parallel>], iteration_bounds = array<i64: 1>, scalar_prefetch = 0 : i64, scratch_operands = 0 : i64, tpu.core_type = #tpu.core_type<tc>, window_params = [{transform_indices = @transform_0, window_bounds = array<i64: 1, 2048>}, {transform_indices = @transform_1, window_bounds = array<i64: 1, 2048>}]} {
    %c0 = arith.constant 0 : index
    %c0_0 = arith.constant 0 : index
    %0 = vector.load %arg1[%c0, %c0_0] : memref<1x2048xf32, #tpu.memory_space<vmem>>, vector<1x2048xf32>
    %c0_1 = arith.constant 0 : index
    %c0_2 = arith.constant 0 : index
    %1 = vector.load %arg2[%c0_1, %c0_2] : memref<1x2048xf32, #tpu.memory_space<vmem>>, vector<1x2048xf32>
    tpu.vector_store %arg2[%c0_1, %c0_2], %0 {strides = array<i32>} : memref<1x2048xf32, #tpu.memory_space<vmem>>, vector<1x2048xf32>,
    return
  }
  func.func @transform_0(%arg0: i32) -> (i32, i32) {
    %c0_i32 = arith.constant 0 : i32
    %c0_i32_0 = arith.constant 0 : i32
    return %arg0, %c0_i32 : i32, i32
  }
  func.func @transform_1(%arg0: i32) -> (i32, i32) {
    %c0_i32 = arith.constant 0 : i32
    %c0_i32_0 = arith.constant 0 : i32
    return %arg0, %c0_i32 : i32, i32
  }
}

</mosaic_0001>

<bundles_post_ra>
// kernel: flatten_pallas.1
= control target key start
LH: loop header
LB: loop body
LE: loop exit
PB: predicated region body
PF: predicated region fallthrough
CT: control target
= control target key end

     0   :  { %s38_s0 = inlined_call_operand.vmem [shape: f32[1,2048], index: 0, kind: input, shape index: {}]   ;;  %s39_s1 = inlined_call_operand.vmem [shape: f32[1,2048], index: 1, kind: output, shape index: {}]  }
   0x1   :  { %v8_v0 = vld [vmem:[%s38_s0] sm:$0xff]  ;;  %v9_v1 = vld [vmem:[%s38_s0 + $0x8] sm:$0xff] }
   0x2   :  { %10 = vst [vmem:[%s39_s1] sm:$0xff] %v8_v0  ;;  %11 = vst [vmem:[%s39_s1 + $0x8] sm:$0xff] %v9_v1 }

</bundles_post_ra>
